<compile_context>
chip_gen: v6e
topology: v6e:2x2x1
jax: 0.10.0
libtpu: 0.0.40
codegen_flags: <defaults>
</compile_context>

<pallas_src>
import functools

import jax
import jax.numpy as jnp
from jax.experimental import pallas as pl
from jax.experimental.pallas import tpu as pltpu


# --------------------------------------------------------------------------
# Kernel
# --------------------------------------------------------------------------
def vae_kernel(x_ref, eps_ref, w_ref, b_ref, out_ref, *, d_in, h1, h2, latent):
    # x: (d_in, Bt), eps: (latent, Bt) -- batch on the 128-lane axis, feature
    # dims (8..32) on sublanes, so every layer is a small W @ X on the MXU and
    # all stores are lane-dense.
    # Row offsets of each layer inside the packed weight/bias slabs (all
    # multiples of 8 for config=[8,32,16], latent=16).
    r0 = 0
    r1 = r0 + h1              # w1  rows
    r2 = r1 + h2              # w2  rows
    r3 = r2 + 2 * latent      # fused [fc_mu ; fc_var] rows
    r4 = r3 + h1              # wd1 rows
    r5 = r4 + d_in            # wd2 rows

    x = x_ref[...]
    eps = eps_ref[...]

    # ---- encoder: Linear(8,32)+ReLU -> Linear(32,16)+ReLU ----
    h = jnp.dot(w_ref[r0:r1, :d_in], x,
                preferred_element_type=jnp.float32) + b_ref[r0:r1, :]
    h = jnp.maximum(h, 0.0)
    h = jnp.dot(w_ref[r1:r2, :h1], h,
                preferred_element_type=jnp.float32) + b_ref[r1:r2, :]
    h = jnp.maximum(h, 0.0)

    # ---- fused fc_mu || fc_var : one (2*latent, hidden) matmul ----
    mv = jnp.dot(w_ref[r2:r3, :h2], h,
                 preferred_element_type=jnp.float32) + b_ref[r2:r3, :]
    mu = mv[:latent, :]
    lv = mv[latent:, :]

    # ---- reparameterize: z = eps * exp(0.5*logVar) + mu  (exp on the EUP) ----
    z = eps * jnp.exp(0.5 * lv) + mu

    # ---- decoder: Linear(16,32)+ReLU -> Linear(32,8)+Sigmoid ----
    d = jnp.dot(w_ref[r3:r4, :latent], z,
                preferred_element_type=jnp.float32) + b_ref[r3:r4, :]
    d = jnp.maximum(d, 0.0)
    o = jnp.dot(w_ref[r4:r5, :h1], d,
                preferred_element_type=jnp.float32) + b_ref[r4:r5, :]

    # numerically stable sigmoid: one exp, one divide (reciprocal reused)
    e = jnp.exp(-jnp.abs(o))
    inv = 1.0 / (1.0 + e)
    o = jnp.where(o >= 0.0, inv, e * inv)

    # ---- single packed, lane-dense output slab: [output ; z ; mu ; logVar] ----
    out_ref[0:d_in, :] = o
    out_ref[d_in:d_in + latent, :] = z
    out_ref[d_in + latent:d_in + 2 * latent, :] = mu
    out_ref[d_in + 2 * latent:, :] = lv


# --------------------------------------------------------------------------
# Tile selection
# --------------------------------------------------------------------------
def _pick_batch_tile(batch):
    # HBM-bound kernel: take the largest lane-dense tile that divides the
    # batch.  Per-tile VMEM (in + out, double buffered) is ~640 B per lane, so
    # a 4096-lane tile is only a few MiB -- comfortably inside the 32 MiB
    # scoped VMEM limit on every generation (v7x's 64 MiB physical included).
    for t in (4096, 2048, 1024, 512, 256, 128):
        if batch % t == 0:
            return t
    return batch  # tiny / odd batch: one full-extent block


# --------------------------------------------------------------------------
# Wrappers
# --------------------------------------------------------------------------
def vae_forward_packed(xt, epst, wslab, bslab, *, config, latent_dim,
                       batch_tile=None):
    """Feature-major contract (no wrapper-side layout passes).

    xt:   (config[0], B)  f32 -- inputs, batch on the lane axis
    epst: (latent_dim, B) f32 -- reparameterization noise
    Returns the packed (config[0] + 3*latent_dim, B) slab
    [output ; z ; mu ; logVar].
    """
    d_in, h1, h2 = config
    assert xt.shape[0] == d_in and epst.shape[0] == latent_dim
    B = xt.shape[1]
    assert epst.shape[1] == B

    if batch_tile is None:
        batch_tile = _pick_batch_tile(B)
    assert B % batch_tile == 0
    grid = (B // batch_tile,)

    d_packed = d_in + 3 * latent_dim  # 8 + 48 = 56 rows (multiple of 8)

    kernel = functools.partial(vae_kernel, d_in=d_in, h1=h1, h2=h2,
                               latent=latent_dim)

    in_specs = [
        pl.BlockSpec((d_in, batch_tile), lambda i: (0, i)),
        pl.BlockSpec((latent_dim, batch_tile), lambda i: (0, i)),
        # Full-extent blocks with constant index_map -> resident across steps.
        pl.BlockSpec(wslab.shape, lambda i: (0, 0)),
        pl.BlockSpec(bslab.shape, lambda i: (0, 0)),
    ]
    out_spec = pl.BlockSpec((d_packed, batch_tile), lambda i: (0, i))

    # Advisory cost hint for the XLA scheduler.
    flops = 2 * B * (d_in * h1 + h1 * h2 + h2 * 2 * latent_dim
                     + latent_dim * h1 + h1 * d_in)
    transcendentals = B * (latent_dim + 2 * d_in)  # reparam exp + sigmoid exp/div
    bytes_accessed = 4 * (B * (d_in + latent_dim + d_packed)
                          + int(wslab.size) + int(bslab.size))

    return pl.pallas_call(
        kernel,
        out_shape=jax.ShapeDtypeStruct((d_packed, B), jnp.float32),
        grid_spec=pltpu.PrefetchScalarGridSpec(
            num_scalar_prefetch=0,
            grid=grid,
            in_specs=in_specs,
            out_specs=out_spec,
        ),
        compiler_params=pltpu.CompilerParams(
            # "parallel" batch axis; on v7x switch to pltpu.CORE_PARALLEL only
            # if a profile shows one TensorCore idle.
            dimension_semantics=("parallel",),
            vmem_limit_bytes=32 * 1024 * 1024,
        ),
        cost_estimate=pl.CostEstimate(
            flops=flops,
            transcendentals=transcendentals,
            bytes_accessed=bytes_accessed),
    )(xt, epst, wslab, bslab)


def unpack_results(packed, d_in, latent):
    """Static row-slices of the packed slab (still feature-major, batch on lanes)."""
    o = packed[0:d_in]
    z = packed[d_in:d_in + latent]
    mu = packed[d_in + latent:d_in + 2 * latent]
    lv = packed[d_in + 2 * latent:]
    return o, z, mu, lv


def vae_forward(x, eps, wslab, bslab, *, config, latent_dim, batch_tile=None):
    """Torch-convention convenience wrapper: (B, feat) in / out.

    NOTE: the transposes here are separate XLA HBM round trips; prefer
    vae_forward_packed in pipelines (feature-major contract, zero layout passes).
    """
    packed = vae_forward_packed(x.T, eps.T, wslab, bslab, config=config,
                                latent_dim=latent_dim, batch_tile=batch_tile)
    o, z, mu, lv = unpack_results(packed, config[0], latent_dim)
    return o.T, z.T, mu.T, lv.T


# --------------------------------------------------------------------------
# Params
# --------------------------------------------------------------------------
def init_linear(key, fan_in, fan_out):
    """PyTorch-style init; weight (out, in), bias (out, 1)."""
    kw, kb = jax.random.split(key)
    bound = 1.0 / (fan_in ** 0.5)
    w = jax.random.uniform(kw, (fan_out, fan_in), jnp.float32, -bound, bound)
    b = jax.random.uniform(kb, (fan_out, 1), jnp.float32, -bound, bound)
    return w, b


def init_vae_params(key, config, latent_dim):
    keys = jax.random.split(key, 6)
    w1, b1 = init_linear(keys[0], config[0], config[1])     # encoder L1
    w2, b2 = init_linear(keys[1], config[1], config[2])     # encoder L2
    wmu, bmu = init_linear(keys[2], config[-1], latent_dim)  # fc_mu
    wvar, bvar = init_linear(keys[3], config[-1], latent_dim)  # fc_var
    wd1, bd1 = init_linear(keys[4], config[2], config[1])   # decoder L1
    wd2, bd2 = init_linear(keys[5], config[1], config[0])   # decoder L2
    # decoder_input = Linear(latent_dim, config[-1]) exists in __init__ but is
    # unused in forward(); intentionally omitted.
    return (w1, b1, w2, b2, wmu, bmu, wvar, bvar, wd1, bd1, wd2, bd2)


def pack_params(raw, config, latent_dim):
    """Pack all weights into one zero-padded (rows, 32) slab and all biases
    into one (rows, 1) slab -> only two resident constant BlockSpec streams."""
    (w1, b1, w2, b2, wmu, bmu, wvar, bvar, wd1, bd1, wd2, bd2) = raw
    width = max(config[0], config[1], config[2], latent_dim)

    def pad(w):
        return jnp.pad(w, ((0, 0), (0, width - w.shape[1])))

    wmv = jnp.concatenate([wmu, wvar], axis=0)   # fused [fc_mu ; fc_var]
    bmv = jnp.concatenate([bmu, bvar], axis=0)
    wslab = jnp.concatenate([pad(w1), pad(w2), pad(wmv), pad(wd1), pad(wd2)],
                            axis=0)              # (120, 32)
    bslab = jnp.concatenate([b1, b2, bmv, bd1, bd2], axis=0)   # (120, 1)
    return wslab, bslab


# --------------------------------------------------------------------------
# Pure-JAX reference
# --------------------------------------------------------------------------
def vae_reference(x, eps, raw):
    (w1, b1, w2, b2, wmu, bmu, wvar, bvar, wd1, bd1, wd2, bd2) = raw
    h = jnp.maximum(x @ w1.T + b1.T, 0.0)
    h = jnp.maximum(h @ w2.T + b2.T, 0.0)
    mu = h @ wmu.T + bmu.T
    lv = h @ wvar.T + bvar.T
    z = eps * jnp.exp(0.5 * lv) + mu
    d = jnp.maximum(z @ wd1.T + bd1.T, 0.0)
    o = jax.nn.sigmoid(d @ wd2.T + bd2.T)
    return o, z, mu, lv


if __name__ == "__main__":
    config = [8, 32, 16]
    latent_dim = 16    # must equal config[-1] for forward() to be well-typed
    batch = 768        # small demo batch -> tile 256, grid of 3 "parallel" steps

    key = jax.random.PRNGKey(0)
    k_x, k_eps, k_p = jax.random.split(key, 3)

    # Feature-major ("batch on lanes") inputs: no wrapper-side transposes.
    # eps is an explicit input (deterministic stand-in for torch.randn_like).
    xt = jax.random.uniform(k_x, (config[0], batch), jnp.float32)
    epst = jax.random.normal(k_eps, (latent_dim, batch), jnp.float32)

    raw = init_vae_params(k_p, config, latent_dim)
    wslab, bslab = pack_params(raw, config, latent_dim)

    packed = jax.block_until_ready(
        vae_forward_packed(xt, epst, wslab, bslab,
                           config=config, latent_dim=latent_dim))

    # sanity check against the plain-JAX reference
    ref_o, ref_z, ref_mu, ref_lv = vae_reference(xt.T, epst.T, raw)
    o, z, mu, lv = unpack_results(packed, config[0], latent_dim)
    for a, b in zip((o, z, mu, lv), (ref_o.T, ref_z.T, ref_mu.T, ref_lv.T)):
        assert a.shape == b.shape
        assert float(jnp.max(jnp.abs(a - b))) < 1e-5

    print("KERNEL_OK")
</pallas_src>

<mosaic_0001>
module attributes {stable_mosaic.version = 11 : i64} {
  func.func @vae_kernel(%arg0: i32, %arg1: memref<8x256xf32, #tpu.memory_space<vmem>>, %arg2: memref<16x256xf32, #tpu.memory_space<vmem>>, %arg3: memref<120x32xf32, #tpu.memory_space<vmem>>, %arg4: memref<120x1xf32, #tpu.memory_space<vmem>>, %arg5: memref<56x256xf32, #tpu.memory_space<vmem>>) attributes {dimension_semantics = [#tpu.dimension_semantics<parallel>], iteration_bounds = array<i64: 3>, scalar_prefetch = 0 : i64, scratch_operands = 0 : i64, tpu.core_type = #tpu.core_type<tc>, window_params = [{transform_indices = @transform_0, window_bounds = array<i64: 8, 256>}, {transform_indices = @transform_1, window_bounds = array<i64: 16, 256>}, {pipeline_mode = #tpu.pipeline_mode<synchronous>, transform_indices = @transform_2, window_bounds = array<i64: 120, 32>}, {pipeline_mode = #tpu.pipeline_mode<synchronous>, transform_indices = @transform_3, window_bounds = array<i64: 120, 1>}, {transform_indices = @transform_4, window_bounds = array<i64: 56, 256>}]} {
    %c0 = arith.constant 0 : index
    %c0_0 = arith.constant 0 : index
    %0 = vector.load %arg1[%c0, %c0_0] : memref<8x256xf32, #tpu.memory_space<vmem>>, vector<8x256xf32>
    %c0_1 = arith.constant 0 : index
    %c0_2 = arith.constant 0 : index
    %1 = vector.load %arg2[%c0_1, %c0_2] : memref<16x256xf32, #tpu.memory_space<vmem>>, vector<16x256xf32>
    %c0_3 = arith.constant 0 : index
    %c0_4 = arith.constant 0 : index
    %2 = vector.load %arg3[%c0_3, %c0_4] : memref<120x32xf32, #tpu.memory_space<vmem>>, vector<32x8xf32>
    %cst = arith.constant dense<0.000000e+00> : vector<32x256xf32>
    %3 = tpu.matmul %2, %0, %cst {dimension_numbers = #tpu.dot_dimension_numbers<[1], [0], [0], [1], [0, 0, 1, 1], [], []>} : vector<32x8xf32>, vector<8x256xf32>, vector<32x256xf32> -> vector<32x256xf32>
    %c0_5 = arith.constant 0 : index
    %c0_6 = arith.constant 0 : index
    %4 = vector.load %arg4[%c0_5, %c0_6] : memref<120x1xf32, #tpu.memory_space<vmem>>, vector<32x1xf32>
    %5 = vector.broadcast %4 : vector<32x1xf32> to vector<32x256xf32>
    %6 = arith.addf %3, %5 : vector<32x256xf32>
    %cst_7 = arith.constant 0.000000e+00 : f32
    %7 = vector.broadcast %cst_7 : f32 to vector<32x256xf32>
    %8 = arith.maximumf %6, %7 : vector<32x256xf32>
    %c32 = arith.constant 32 : index
    %c0_8 = arith.constant 0 : index
    %9 = vector.load %arg3[%c32, %c0_8] : memref<120x32xf32, #tpu.memory_space<vmem>>, vector<16x32xf32>
    %cst_9 = arith.constant dense<0.000000e+00> : vector<16x256xf32>
    %10 = tpu.matmul %9, %8, %cst_9 {dimension_numbers = #tpu.dot_dimension_numbers<[1], [0], [0], [1], [0, 0, 1, 1], [], []>} : vector<16x32xf32>, vector<32x256xf32>, vector<16x256xf32> -> vector<16x256xf32>
    %c32_10 = arith.constant 32 : index
    %c0_11 = arith.constant 0 : index
    %11 = vector.load %arg4[%c32_10, %c0_11] : memref<120x1xf32, #tpu.memory_space<vmem>>, vector<16x1xf32>
    %12 = vector.broadcast %11 : vector<16x1xf32> to vector<16x256xf32>
    %13 = arith.addf %10, %12 : vector<16x256xf32>
    %cst_12 = arith.constant 0.000000e+00 : f32
    %14 = vector.broadcast %cst_12 : f32 to vector<16x256xf32>
    %15 = arith.maximumf %13, %14 : vector<16x256xf32>
    %c48 = arith.constant 48 : index
    %c0_13 = arith.constant 0 : index
    %16 = vector.load %arg3[%c48, %c0_13] : memref<120x32xf32, #tpu.memory_space<vmem>>, vector<32x16xf32>
    %cst_14 = arith.constant dense<0.000000e+00> : vector<32x256xf32>
    %17 = tpu.matmul %16, %15, %cst_14 {dimension_numbers = #tpu.dot_dimension_numbers<[1], [0], [0], [1], [0, 0, 1, 1], [], []>} : vector<32x16xf32>, vector<16x256xf32>, vector<32x256xf32> -> vector<32x256xf32>
    %c48_15 = arith.constant 48 : index
    %c0_16 = arith.constant 0 : index
    %18 = vector.load %arg4[%c48_15, %c0_16] : memref<120x1xf32, #tpu.memory_space<vmem>>, vector<32x1xf32>
    %19 = vector.broadcast %18 : vector<32x1xf32> to vector<32x256xf32>
    %20 = arith.addf %17, %19 : vector<32x256xf32>
    %21 = vector.extract_strided_slice %20 {offsets = [0, 0], sizes = [16, 256], strides = [1, 1]} : vector<32x256xf32> to vector<16x256xf32>
    %22 = vector.extract_strided_slice %20 {offsets = [16, 0], sizes = [16, 256], strides = [1, 1]} : vector<32x256xf32> to vector<16x256xf32>
    %cst_17 = arith.constant 5.000000e-01 : f32
    %23 = vector.broadcast %cst_17 : f32 to vector<16x256xf32>
    %24 = arith.mulf %23, %22 : vector<16x256xf32>
    %25 = math.exp %24 : vector<16x256xf32>
    %26 = arith.mulf %1, %25 : vector<16x256xf32>
    %27 = arith.addf %26, %21 : vector<16x256xf32>
    %c80 = arith.constant 80 : index
    %c0_18 = arith.constant 0 : index
    %28 = vector.load %arg3[%c80, %c0_18] : memref<120x32xf32, #tpu.memory_space<vmem>>, vector<32x16xf32>
    %cst_19 = arith.constant dense<0.000000e+00> : vector<32x256xf32>
    %29 = tpu.matmul %28, %27, %cst_19 {dimension_numbers = #tpu.dot_dimension_numbers<[1], [0], [0], [1], [0, 0, 1, 1], [], []>} : vector<32x16xf32>, vector<16x256xf32>, vector<32x256xf32> -> vector<32x256xf32>
    %c80_20 = arith.constant 80 : index
    %c0_21 = arith.constant 0 : index
    %30 = vector.load %arg4[%c80_20, %c0_21] : memref<120x1xf32, #tpu.memory_space<vmem>>, vector<32x1xf32>
    %31 = vector.broadcast %30 : vector<32x1xf32> to vector<32x256xf32>
    %32 = arith.addf %29, %31 : vector<32x256xf32>
    %cst_22 = arith.constant 0.000000e+00 : f32
    %33 = vector.broadcast %cst_22 : f32 to vector<32x256xf32>
    %34 = arith.maximumf %32, %33 : vector<32x256xf32>
    %c112 = arith.constant 112 : index
    %c0_23 = arith.constant 0 : index
    %35 = vector.load %arg3[%c112, %c0_23] : memref<120x32xf32, #tpu.memory_space<vmem>>, vector<8x32xf32>
    %cst_24 = arith.constant dense<0.000000e+00> : vector<8x256xf32>
    %36 = tpu.matmul %35, %34, %cst_24 {dimension_numbers = #tpu.dot_dimension_numbers<[1], [0], [0], [1], [0, 0, 1, 1], [], []>} : vector<8x32xf32>, vector<32x256xf32>, vector<8x256xf32> -> vector<8x256xf32>
    %c112_25 = arith.constant 112 : index
    %c0_26 = arith.constant 0 : index
    %37 = vector.load %arg4[%c112_25, %c0_26] : memref<120x1xf32, #tpu.memory_space<vmem>>, vector<8x1xf32>
    %38 = vector.broadcast %37 : vector<8x1xf32> to vector<8x256xf32>
    %39 = arith.addf %36, %38 : vector<8x256xf32>
    %40 = math.absf %39 : vector<8x256xf32>
    %cst_27 = arith.constant 0.000000e+00 : f32
    %41 = vector.broadcast %cst_27 : f32 to vector<8x256xf32>
    %42 = arith.subf %41, %40 : vector<8x256xf32>
    %43 = math.exp %42 : vector<8x256xf32>
    %cst_28 = arith.constant 1.000000e+00 : f32
    %44 = vector.broadcast %cst_28 : f32 to vector<8x256xf32>
    %45 = arith.addf %44, %43 : vector<8x256xf32>
    %cst_29 = arith.constant 1.000000e+00 : f32
    %46 = vector.broadcast %cst_29 : f32 to vector<8x256xf32>
    %47 = arith.divf %46, %45 : vector<8x256xf32>
    %cst_30 = arith.constant 0.000000e+00 : f32
    %48 = vector.broadcast %cst_30 : f32 to vector<8x256xf32>
    %49 = arith.cmpf oge, %39, %48 : vector<8x256xf32>
    %50 = arith.mulf %43, %47 : vector<8x256xf32>
    %51 = arith.select %49, %47, %50 : vector<8x256xi1>, vector<8x256xf32>
    %c0_31 = arith.constant 0 : index
    %c0_32 = arith.constant 0 : index
    %52 = vector.load %arg5[%c0_31, %c0_32] : memref<56x256xf32, #tpu.memory_space<vmem>>, vector<8x256xf32>
    tpu.vector_store %arg5[%c0_31, %c0_32], %51 {strides = array<i32>} : memref<56x256xf32, #tpu.memory_space<vmem>>, vector<8x256xf32>,
    %c8 = arith.constant 8 : index
    %c0_33 = arith.constant 0 : index
    %53 = vector.load %arg5[%c8, %c0_33] : memref<56x256xf32, #tpu.memory_space<vmem>>, vector<16x256xf32>
    tpu.vector_store %arg5[%c8, %c0_33], %27 {strides = array<i32>} : memref<56x256xf32, #tpu.memory_space<vmem>>, vector<16x256xf32>,
    %c24 = arith.constant 24 : index
    %c0_34 = arith.constant 0 : index
    %54 = vector.load %arg5[%c24, %c0_34] : memref<56x256xf32, #tpu.memory_space<vmem>>, vector<16x256xf32>
    tpu.vector_store %arg5[%c24, %c0_34], %21 {strides = array<i32>} : memref<56x256xf32, #tpu.memory_space<vmem>>, vector<16x256xf32>,
    %c40 = arith.constant 40 : index
    %c0_35 = arith.constant 0 : index
    %55 = vector.load %arg5[%c40, %c0_35] : memref<56x256xf32, #tpu.memory_space<vmem>>, vector<16x256xf32>
    tpu.vector_store %arg5[%c40, %c0_35], %22 {strides = array<i32>} : memref<56x256xf32, #tpu.memory_space<vmem>>, vector<16x256xf32>,
    return
  }
  func.func @transform_0(%arg0: i32) -> (i32, i32) {
    %c0_i32 = arith.constant 0 : i32
    %c0_i32_0 = arith.constant 0 : i32
    return %c0_i32, %arg0 : i32, i32
  }
  func.func @transform_1(%arg0: i32) -> (i32, i32) {
    %c0_i32 = arith.constant 0 : i32
    %c0_i32_0 = arith.constant 0 : i32
    return %c0_i32, %arg0 : i32, i32
  }
  func.func @transform_2(%arg0: i32) -> (i32, i32) {
    %c0_i32 = arith.constant 0 : i32
    %c0_i32_0 = arith.constant 0 : i32
    %c0_i32_1 = arith.constant 0 : i32
    return %c0_i32, %c0_i32_0 : i32, i32
  }
  func.func @transform_3(%arg0: i32) -> (i32, i32) {
    %c0_i32 = arith.constant 0 : i32
    %c0_i32_0 = arith.constant 0 : i32
    %c0_i32_1 = arith.constant 0 : i32
    return %c0_i32, %c0_i32_0 : i32, i32
  }
  func.func @transform_4(%arg0: i32) -> (i32, i32) {
    %c0_i32 = arith.constant 0 : i32
    %c0_i32_0 = arith.constant 0 : i32
    return %c0_i32, %arg0 : i32, i32
  }
}

</mosaic_0001>

<bundles_post_ra>
// kernel: tpu_custom_call.1
= control target key start
LH: loop header
LB: loop body
LE: loop exit
PB: predicated region body
PF: predicated region fallthrough
CT: control target
= control target key end

     0   :  { %9 = vsyncpa [#allocation4], 0  ;;  %s1424_s0 = inlined_call_operand.vmem [shape: f32[8,768], index: 0, kind: input, shape index: {}]   ;;  %s1425_s1 = inlined_call_operand.vmem [shape: f32[16,768], index: 1, kind: input, shape index: {}]   ;;  %s1426_s2 = inlined_call_operand.vmem [shape: f32[120,32], index: 2, kind: input, shape index: {}]   ;;  %s1427_s3 = inlined_call_operand.vmem [shape: f32[120,1], index: 3, kind: input, shape index: {}]   ;;  %s1428_s4 = inlined_call_operand.hbm [shape: f32[56,768], index: 4, kind: output, shape index: {}]  }
   0x1   :  { %11 = vsyncpa [#allocation4 + $0x1], 0  ;;  %s1175_s15 = smov 0   ;;  %s1177_s16 = smov 0  }
   0x2   :  { %s1179_s17 = smov 0   ;;  %s1181_s18 = smov 0  }
   0x3 LB: > { %s1196_s19 = sadd.s32 4294967295, %s1142_s18   ;;  %s988_s20 = sadd.s32 4294967294, %s1142_s18   ;;  %s1142_s18 = sphi %s1181_s18, %s1434_s18   ;;  %s1138_s17 = sphi %s1179_s17, %s1433_s17   ;;  %s1134_s16 = sphi %s1177_s16, %s1432_s16   ;;  %s1130_s15 = sphi %s1175_s15, %s1431_s15  }
   0x4   : > { %s1200_s21 = sadd.s32 1, %s1142_s18   ;;  %s50_s22 = sadd.s32 1, %s1138_s17 }
   0x5   : > { %s47_s23 = ssub.s32 %s1142_s18, %s1200_s21  ;;  %p57_p0 = scmp.ne.s32.totalorder %s1138_s17, %s1134_s16 }
   0x6   : > { %p48_p1 = scmp.eq.s32.totalorder %s47_s23, 0  ;;  %p58_p2 = scmp.eq.s32.totalorder %s1142_s18, 0 }
   0x7   : > { %p129_p3 = scmp.eq.s32.totalorder %s1196_s19, 2  ;;  %p134_p4 = scmp.ne.s32.totalorder %s1134_s16, %s1130_s15 }
   0x8   : > { %s1212_s24 = scalar_select %p48_p1, %s1138_s17, %s50_s22  }
   0x9   : > { %p59_p5 = por %p58_p2, %p57_p0  ;;  %p1214_p6 = por %p129_p3, %p57_p0 }
   0xa   : > { %p135_p7 = scmp.eq.s32.totalorder %s988_s20, 2  ;;  %p990_p9 = scmp.ge.s32.totalorder %s1142_s18, 3 }
   0xc   : > { %p1218_p8 = por %p135_p7, %p134_p4  ;;  %157 = sbr.rel (%p990_p9) target bundleno = 23 (0x17), region = 24 }
  0x11   : > { %169 = sbr.rel (!%p59_p5) target bundleno = 23 (0x17), region = 32  ;;  %s171_s27 = sand.u32 (%p59_p5), 1, %s1138_s17  }
  0x12   : > { %s1017_s28 = sshll.u32 (%p59_p5), %s1142_s18, 4  ;;  %s991_s29 = sshll.u32 (%p59_p5), %s171_s27, 5 }
  0x13   : > { %s176_s6 = scalar_lea.vmem (%p59_p5), %s1425_s1, %s1017_s28  ;;  %s173_s7 = scalar_lea.vmem (%p59_p5), [#allocation2], %s991_s29 }
  0x14   : > { %v189_v0 = vld [vmem:[%s176_s6] sm:$0xff] (%p59_p5)  ;;  %v191_v1 = vld [vmem:[%s176_s6 + $0x8] sm:$0xff] (%p59_p5)  ;;  %v193_v2 = vld [vmem:[%s176_s6 + $0x30] sm:$0xff] (%p59_p5) }
  0x15   : > { %190 = vst [vmem:[%s173_s7] sm:$0xff] (%p59_p5), %v189_v0  ;;  %192 = vst [vmem:[%s173_s7 + $0x8] sm:$0xff] (%p59_p5), %v191_v1  ;;  %v195_v3 = vld [vmem:[%s176_s6 + $0x38] sm:$0xff] (%p59_p5) }
  0x16   : > { %194 = vst [vmem:[%s173_s7 + $0x10] sm:$0xff] %v193_v2  ;;  %196 = vst [vmem:[%s173_s7 + $0x18] sm:$0xff] %v195_v3 }
  0x17 PF: > { %p994_p10 = scmp.ge.s32.totalorder %s1142_s18, 1  ;;  %p201_p11 = scmp.lt.s32.totalorder %s1142_s18, 4 }
  0x19   : > { %p202_p12 = pnand %p994_p10, %p201_p11 }
  0x1a   : > { %s996_s8 = sshll.u32 (!%p202_p12), %s1196_s19, 1  ;;  %s1332_s12 = sand.u32 (!%p202_p12), 1, %s1134_s16  }
  0x1b   : > { %205 = sbr.rel (%p202_p12) target bundleno = 1169 (0x491), region = 55  ;;  %p239_p13 = scmp.lt.s32.totalorder (!%p202_p12), %s996_s8, 5 }
  0x1c   : > { %s1019_s13 = smul.u32 (!%p202_p12), 112, %s1332_s12  ;;  %s995_s20 = sshll.u32 (!%p202_p12), %s1332_s12, 5 }
  0x1d   : > { %s210_s22 = scalar_lea.vmem (!%p202_p12), [#allocation2], %s995_s20  ;;  %s1018_s10 = sshll.u32 (!%p202_p12), %s1196_s19, 8 }
  0x1e   : > { %s1335_s14 = scalar_lea.vmem (!%p202_p12), [#allocation3], %s1019_s13  ;;  %s895_s19 = scalar_lea.sflag (!%p202_p12), [#allocation4], %s1332_s12 }
  0x1f   : > { %s908_s11 = sshll.u32 (!%p202_p12), %s1335_s14, 4  ;;  %s1146_s27 = smov (!%p202_p12), [#allocation3]   ;;  %s1380_s11 = int_to_ptr.vmem [resolvable:$true] %s908_s11 }
  0x20   : > { %v1144_v4 = vmov 0.0   ;;  %v259_v5 = vld [vmem:[%s1427_s3 + $0x18] sm:$0xff]  ;;  %v1145_v6 = vmov 0   ;;  %v257_v7 = vld [vmem:[%s1427_s3 + $0x8] sm:$0xff]  ;;  %s1436_s8 = smov (!%p239_p13, %s996_s8), 5  ;;  %v258_v8 = vld [vmem:[%s1427_s3 + $0x10] sm:$0xff] }
  0x21   : > { %357 = vmatprep.mubr.f32.mxu0 %v1144_v4  ;;  %475 = vmatprep.mubr.f32.mxu1 %v1144_v4  ;;  %v256_v9 = vld [vmem:[%s1427_s3] sm:$0xff]  ;;  %s997_s23 = sshll.u32 %s1436_s8, 3  ;;  %vm280_vm0 = vcmask 64512   ;;  %v393_v13 = vld [vmem:[%s1427_s3 + $0x28] sm:$0xff]  ;;  %v254_v18 = vld [vmem:[%s1426_s2 + $0x10] sm:$0xff]  ;;  %vm404_vm1 = vcmask 261120  }
  0x22   : > { %1064 = vset.pattern.permute.xlu0 %v1145_v6  ;;  %1065 = vset.pattern.permute.xlu1 %v1145_v6  ;;  %s242_s29 = scalar_lea.vmem %s1424_s0, %s997_s23  ;;  %v252_v12 = vld [vmem:[%s1426_s2] sm:$0xff]  ;;  %v253_v15 = vld [vmem:[%s1426_s2 + $0x8] sm:$0xff]  ;;  %v497_v19 = vld [vmem:[%s1427_s3 + $0x38] sm:$0xff]  ;;  %vm520_vm2 = vcmask 130048   ;;  %s1082_s23 = scalar_lea.vmem %s1380_s11, 1792 }
  0x23   : > { %277 = vperm.xlu0 %1064, %v259_v5   ;;  %267 = vperm.xlu1 %1065, %v257_v7   ;;  %v247_v10 = vld [vmem:[%s242_s29 + $0x8] sm:$0xff]  ;;  %v246_v11 = vld [vmem:[%s242_s29] sm:$0xff]  ;;  %v496_v20 = vld [vmem:[%s1427_s3 + $0x30] sm:$0xff]  ;;  %p1083_p0 = scmp.ne.s32.totalorder %s1380_s11, %s1082_s23  ;;  %s1086_s28 = sshll.u32 %s1146_s27, 4  ;;  %s1087_s28 = int_to_ptr.vmem [resolvable:$false] %s1086_s28 }
  0x24   : > { %323 = vmatprep.subr.mxu0 %v247_v10  ;;  %v392_v14 = vld [vmem:[%s1427_s3 + $0x20] sm:$0xff]  ;;  %v499_v16 = vld [vmem:[%s1427_s3 + $0x48] sm:$0xff]  ;;  %v255_v21 = vld [vmem:[%s1426_s2 + $0x18] sm:$0xff]  ;;  %s1088_s29 = scalar_lea.vmem %s1087_s28, 3584  ;;  %p1089_p3 = scmp.lt.s32.totalorder %s1380_s11, %s1087_s28 }
  0x25   : > { %324 = vmatpush1.msra.mxu0 %v246_v11  ;;  %v498_v17 = vld [vmem:[%s1427_s3 + $0x40] sm:$0xff]  ;;  %v649_v22 = vld [vmem:[%s1427_s3 + $0x68] sm:$0xff]  ;;  %v647_v24 = vld [vmem:[%s1427_s3 + $0x58] sm:$0xff]  ;;  %p1084_p1 = pnand %p1083_p0, %p1214_p6  ;;  %p1090_p4 = scmp.lt.s32.totalorder %s1088_s29, %s1082_s23 }
  0x26   : > { %998 = vmatmul.mubr.msk.f32.vlgmr.msra.gmra.mxu0 %vm280_vm0, %v252_v12  ;;  %v648_v23 = vld [vmem:[%s1427_s3 + $0x60] sm:$0xff]  ;;  %v646_v25 = vld [vmem:[%s1427_s3 + $0x50] sm:$0xff]  ;;  %v391_v56 = vld [vmem:[%s1426_s2 + $0x28] sm:$0xff] }
  0x27   : > { %272 = vperm.xlu0 %1064, %v258_v8   ;;  %262 = vperm.xlu1 %1065, %v256_v9   ;;  %v780_v26 = vld [vmem:[%s1427_s3 + $0x70] sm:$0xff]  ;;  %v390_v55 = vld [vmem:[%s1426_s2 + $0x20] sm:$0xff]  ;;  %v493_v9 = vld [vmem:[%s1426_s2 + $0x38] sm:$0xff]  ;;  %p1085_p2 = pneg %p1084_p1  ;;  %p1091_p5 = por %p1090_p4, %p1089_p3 }
  0x28   : > { %363 = vmatprep.mubr.f32.mxu0 %v1144_v4  ;;  %v492_v8 = vld [vmem:[%s1426_s2 + $0x30] sm:$0xff]  ;;  %v494_v10 = vld [vmem:[%s1426_s2 + $0x40] sm:$0xff]  ;;  %v495_v11 = vld [vmem:[%s1426_s2 + $0x48] sm:$0xff] }
  0x29   : > { %p1092_p7 = pnand %p1091_p5, %p1085_p2 }
  0x2a   : > { %999 = vmatmul.mubr.msk.f32.gmra.mxu0 %vm280_vm0, %v253_v15 }
  0x2b   : > { %401 = vperm.xlu0 %1064, %v393_v13   ;;  %396 = vperm.xlu1 %1065, %v392_v14  }
  0x2c   : > { %369 = vmatprep.mubr.f32.mxu0 %v1144_v4 }
  0x2e   : > { %1000 = vmatmul.mubr.msk.f32.gmra.mxu0 %vm280_vm0, %v254_v18 }
  0x2f   : > { %517 = vperm.xlu0 %1064, %v499_v16   ;;  %512 = vperm.xlu1 %1065, %v498_v17  }
  0x30   : > { %375 = vmatprep.mubr.f32.mxu0 %v1144_v4 }
  0x32   : > { %1001 = vmatmul.mubr.msk.f32.gmra.mxu0 %vm280_vm0, %v255_v21 }
  0x33   : > { %507 = vperm.xlu0 %1064, %v497_v19   ;;  %502 = vperm.xlu1 %1065, %v496_v20  }
  0x34   : > { %746 = vmatprep.mubr.f32.mxu0 %v1144_v4 }
  0x37   : > { %667 = vperm.xlu0 %1064, %v649_v22   ;;  %662 = vperm.xlu1 %1065, %v648_v23  }
  0x3b   : > { %657 = vperm.xlu0 %1064, %v647_v24   ;;  %652 = vperm.xlu1 %1065, %v646_v25  }
  0x3f   : > { %783 = vperm.xlu0 %1064, %v780_v26  }
  0x9e   : > { %v278_v31 = vpop.permute.xlu0 %277  ;;  %v268_v34 = vpop.permute.xlu1 %267 }
  0xa2   : > { %v273_v36 = vpop.permute.xlu0 %272  ;;  %v263_v44 = vpop.permute.xlu1 %262 }
  0xa6   : > { %v402_v60 = vpop.permute.xlu0 %401  ;;  %v397_v61 = vpop.permute.xlu1 %396 }
  0xaa   : > { %v513_v12 = vpop.permute.xlu1 %512  ;;  %v518_v13 = vpop.permute.xlu0 %517 }
  0xae   : > { %v503_v14 = vpop.permute.xlu1 %502  ;;  %v508_v19 = vpop.permute.xlu0 %507 }
  0xe6   : > { %v359_v27 = vpop.f32.mrf.mxu0 }
  0xe7   : > { %v360_v49 = vadd.f32 %v359_v27, %v263_v44 }
  0xe8   : > { %v361_v28 = vpop.f32.mrf.mxu0 }
  0xe9   : > { %v362_v47 = vadd.f32 %v361_v28, %v263_v44  ;;  %v382_v54 = vmax.f32 %v360_v49, 0.0  ;;  %v251_v49 = vld [vmem:[%s210_s22 + $0x18] sm:$0xff] }
  0xea   : > { %v365_v29 = vpop.f32.mrf.mxu0 }
  0xeb   : > { %v366_v45 = vadd.f32 %v365_v29, %v268_v34  ;;  %v383_v53 = vmax.f32 %v362_v47, 0.0 }
  0xec   : > { %v367_v30 = vpop.f32.mrf.mxu0 }
  0xed   : > { %v368_v42 = vadd.f32 %v367_v30, %v268_v34  ;;  %v384_v52 = vmax.f32 %v366_v45, 0.0  ;;  %v250_v45 = vld [vmem:[%s210_s22 + $0x10] sm:$0xff] }
  0xee   : > { %v371_v32 = vpop.f32.mrf.mxu0 }
  0xef   : > { %v372_v41 = vadd.f32 %v371_v32, %v273_v36  ;;  %v385_v51 = vmax.f32 %v368_v42, 0.0  ;;  %v249_v42 = vld [vmem:[%s210_s22 + $0x8] sm:$0xff] }
  0xf0   : > { %v373_v33 = vpop.f32.mrf.mxu0 }
  0xf1   : > { %v374_v39 = vadd.f32 %v373_v33, %v273_v36  ;;  %v386_v50 = vmax.f32 %v372_v41, 0.0 }
  0xf2   : > { %v377_v35 = vpop.f32.mrf.mxu0 }
  0xf3   : > { %v378_v37 = vadd.f32 %v377_v35, %v278_v31  ;;  %v387_v48 = vmax.f32 %v374_v39, 0.0 }
  0xf4   : > { %v379_v38 = vpop.f32.mrf.mxu0 }
  0xf5   : > { %v380_v40 = vadd.f32 %v379_v38, %v278_v31  ;;  %v388_v46 = vmax.f32 %v378_v37, 0.0 }
  0xf7   : > { %v389_v43 = vmax.f32 %v380_v40, 0.0  ;;  %v248_v40 = vld [vmem:[%s210_s22] sm:$0xff]  ;;  %s1378_s22 = scalar_lea.hbm %s1428_s4, %s1018_s10 }
  0xf9   : > { %435 = vmatprep.subr.mxu1 %v389_v43 }
  0xfa   : > { %436 = vmatpush1.msra.mxu1 %v388_v46 }
  0xfb   : > { %437 = vmatprep.subr.mxu1 %v387_v48 }
  0xfc   : > { %438 = vmatpush1.msra.mxu1 %v386_v50 }
  0xfd   : > { %439 = vmatprep.subr.mxu1 %v385_v51 }
  0xfe   : > { %440 = vmatpush1.msra.mxu1 %v384_v52 }
  0xff   : > { %441 = vmatprep.subr.mxu1 %v383_v53 }
 0x100   : > { %442 = vmatpush1.msra.mxu1 %v382_v54 }
 0x101   : > { %1002 = vmatmul.mubr.msk.f32.vlgmr.msra.gmra.mxu1 %vm404_vm1, %v390_v55 }
 0x102   : > { %481 = vmatprep.mubr.f32.mxu1 %v1144_v4 }
 0x105   : > { %1003 = vmatmul.mubr.msk.f32.gmra.mxu1 %vm404_vm1, %v391_v56  ;;  %v642_v56 = vld [vmem:[%s1426_s2 + $0x50] sm:$0xff] }
 0x106   : > { %597 = vmatprep.mubr.f32.mxu1 %v1144_v4 }
 0x1c1   : > { %v477_v57 = vpop.f32.mrf.mxu1 }
 0x1c2   : > { %v478_v2 = vadd.f32 %v477_v57, %v397_v61  ;;  %v643_v57 = vld [vmem:[%s1426_s2 + $0x58] sm:$0xff] }
 0x1c3   : > { %v479_v58 = vpop.f32.mrf.mxu1 }
 0x1c4   : > { %v480_v0 = vadd.f32 %v479_v58, %v397_v61  ;;  %v488_v7 = vmax.f32 %v478_v2, 0.0  ;;  %v644_v58 = vld [vmem:[%s1426_s2 + $0x60] sm:$0xff] }
 0x1c5   : > { %v483_v59 = vpop.f32.mrf.mxu1 }
 0x1c6   : > { %v484_v62 = vadd.f32 %v483_v59, %v402_v60  ;;  %v489_v6 = vmax.f32 %v480_v0, 0.0  ;;  %v645_v59 = vld [vmem:[%s1426_s2 + $0x68] sm:$0xff] }
 0x1c7   : > { %v485_v63 = vpop.f32.mrf.mxu1 }
 0x1c8   : > { %v486_v1 = vadd.f32 %v485_v63, %v402_v60  ;;  %v490_v5 = vmax.f32 %v484_v62, 0.0 }
 0x1ca   : > { %v491_v3 = vmax.f32 %v486_v1, 0.0  ;;  %v668_v1 = vpop.permute.xlu0 %667 }
 0x1cc   : > { %561 = vmatprep.subr.mxu1 %v491_v3  ;;  %v663_v3 = vpop.permute.xlu1 %662 }
 0x1cd   : > { %562 = vmatpush1.msra.mxu1 %v490_v5 }
 0x1ce   : > { %563 = vmatprep.subr.mxu1 %v489_v6 }
 0x1cf   : > { %564 = vmatpush1.msra.mxu1 %v488_v7 }
 0x1d0   : > { %1004 = vmatmul.mubr.msk.f32.vlgmr.msra.gmra.mxu1 %vm520_vm2, %v492_v8 }
 0x1d1   : > { %603 = vmatprep.mubr.f32.mxu1 %v1144_v4 }
 0x1d4   : > { %1005 = vmatmul.mubr.msk.f32.gmra.mxu1 %vm520_vm2, %v493_v9 }
 0x1d5   : > { %609 = vmatprep.mubr.f32.mxu1 %v1144_v4 }
 0x1d8   : > { %1006 = vmatmul.mubr.msk.f32.gmra.mxu1 %vm520_vm2, %v494_v10 }
 0x1d9   : > { %615 = vmatprep.mubr.f32.mxu1 %v1144_v4 }
 0x1dc   : > { %1007 = vmatmul.mubr.msk.f32.gmra.mxu1 %vm520_vm2, %v495_v11 }
 0x1dd   : > { %853 = vmatprep.mubr.f32.mxu1 %v1144_v4 }
 0x290   : > { %v599_v15 = vpop.f32.mrf.mxu1 }
 0x291   : > { %v600_v16 = vadd.f32 %v599_v15, %v503_v14 }
 0x292   : > { %v601_v17 = vpop.f32.mrf.mxu1 }
 0x293   : > { %886 = vst [vmem:[%s1335_s14 + $0x30] sm:$0xff] %v600_v16  ;;  %v602_v18 = vadd.f32 %v601_v17, %v503_v14 }
 0x294   : > { %v605_v20 = vpop.f32.mrf.mxu1 }
 0x295   : > { %887 = vst [vmem:[%s1335_s14 + $0x38] sm:$0xff] %v602_v18  ;;  %v606_v21 = vadd.f32 %v605_v20, %v508_v19 }
 0x296   : > { %v607_v22 = vpop.f32.mrf.mxu1 }
 0x297   : > { %888 = vst [vmem:[%s1335_s14 + $0x40] sm:$0xff] %v606_v21  ;;  %v608_v23 = vadd.f32 %v607_v22, %v508_v19 }
 0x298   : > { %v611_v24 = vpop.f32.mrf.mxu1 }
 0x299   : > { %889 = vst [vmem:[%s1335_s14 + $0x48] sm:$0xff] %v608_v23  ;;  %v612_v25 = vadd.f32 %v611_v24, %v513_v12  ;;  %v779_v24 = vld [vmem:[%s1426_s2 + $0x70] sm:$0xff] }
 0x29a   : > { %v613_v26 = vpop.f32.mrf.mxu1 }
 0x29b   : > { %v622_v27 = vmul.f32 0.5, %v612_v25  ;;  %890 = vst [vmem:[%s1335_s14 + $0x50] sm:$0xff] %v612_v25  ;;  %v614_v28 = vadd.f32 %v613_v26, %v513_v12 }
 0x29c   : > { %v617_v29 = vpop.f32.mrf.mxu1 }
 0x29d   : > { %v626_v30 = vmul.f32 1.442695, %v622_v27  ;;  %v623_v31 = vmul.f32 0.5, %v614_v28  ;;  %891 = vst [vmem:[%s1335_s14 + $0x58] sm:$0xff] %v614_v28  ;;  %v618_v32 = vadd.f32 %v617_v29, %v518_v13 }
 0x29e   : > { %v619_v33 = vpop.f32.mrf.mxu1 }
 0x29f   : > { %1066 = vpow2.f32 %v626_v30  ;;  %v628_v34 = vmul.f32 1.442695, %v623_v31  ;;  %v624_v35 = vmul.f32 0.5, %v618_v32  ;;  %892 = vst [vmem:[%s1335_s14 + $0x60] sm:$0xff] %v618_v32  ;;  %v620_v36 = vadd.f32 %v619_v33, %v518_v13  ;;  %v653_v13 = vpop.permute.xlu1 %652 }
 0x2a1   : > { %1068 = vpow2.f32 %v628_v34  ;;  %v630_v37 = vmul.f32 1.442695, %v624_v35  ;;  %v625_v38 = vmul.f32 0.5, %v620_v36  ;;  %893 = vst [vmem:[%s1335_s14 + $0x68] sm:$0xff] %v620_v36 }
 0x2a3   : > { %1070 = vpow2.f32 %v630_v37  ;;  %v632_v39 = vmul.f32 1.442695, %v625_v38 }
 0x2a5   : > { %1072 = vpow2.f32 %v632_v39 }
 0x2ac   : > { %v1067_v41 = vpop.eup %1066 }
 0x2ad   : > { %v634_v43 = vmul.f32 %v1067_v41, %v248_v40 }
 0x2ae   : > { %v1069_v44 = vpop.eup %1068 }
 0x2af   : > { %v635_v46 = vmul.f32 %v1069_v44, %v249_v42  ;;  %v638_v47 = vadd.f32 %v634_v43, %v600_v16 }
 0x2b0   : > { %v1071_v48 = vpop.eup %1070 }
 0x2b1   : > { %v636_v50 = vmul.f32 %v1071_v48, %v250_v45  ;;  %v639_v51 = vadd.f32 %v635_v46, %v602_v18  ;;  %882 = vst [vmem:[%s1335_s14 + $0x10] sm:$0xff] %v638_v47 }
 0x2b2   : > { %v1073_v52 = vpop.eup %1072 }
 0x2b3   : > { %v637_v53 = vmul.f32 %v1073_v52, %v251_v49  ;;  %v640_v54 = vadd.f32 %v636_v50, %v606_v21  ;;  %883 = vst [vmem:[%s1335_s14 + $0x18] sm:$0xff] %v639_v51 }
 0x2b5   : > { %v641_v55 = vadd.f32 %v637_v53, %v608_v23  ;;  %884 = vst [vmem:[%s1335_s14 + $0x20] sm:$0xff] %v640_v54 }
 0x2b7   : > { %710 = vmatprep.subr.mxu0 %v641_v55  ;;  %885 = vst [vmem:[%s1335_s14 + $0x28] sm:$0xff] %v641_v55 }
 0x2b8   : > { %711 = vmatpush1.msra.mxu0 %v640_v54 }
 0x2b9   : > { %712 = vmatprep.subr.mxu0 %v639_v51 }
 0x2ba   : > { %713 = vmatpush1.msra.mxu0 %v638_v47 }
 0x2bb   : > { %1008 = vmatmul.mubr.msk.f32.vlgmr.msra.gmra.mxu0 %vm520_vm2, %v642_v56 }
 0x2bc   : > { %752 = vmatprep.mubr.f32.mxu0 %v1144_v4 }
 0x2bf   : > { %1009 = vmatmul.mubr.msk.f32.gmra.mxu0 %vm520_vm2, %v643_v57 }
 0x2c0   : > { %758 = vmatprep.mubr.f32.mxu0 %v1144_v4 }
 0x2c3   : > { %1010 = vmatmul.mubr.msk.f32.gmra.mxu0 %vm520_vm2, %v644_v58 }
 0x2c4   : > { %764 = vmatprep.mubr.f32.mxu0 %v1144_v4  ;;  %v658_v4 = vpop.permute.xlu0 %657 }
 0x2c7   : > { %1011 = vmatmul.mubr.msk.f32.gmra.mxu0 %vm520_vm2, %v645_v59 }
 0x2c8   : > { %v784_v25 = vpop.permute.xlu0 %783 }
 0x37b   : > { %v748_v60 = vpop.f32.mrf.mxu0 }
 0x37c   : > { %v749_v18 = vadd.f32 %v748_v60, %v653_v13 }
 0x37d   : > { %v750_v61 = vpop.f32.mrf.mxu0 }
 0x37e   : > { %v751_v16 = vadd.f32 %v750_v61, %v653_v13  ;;  %v771_v23 = vmax.f32 %v749_v18, 0.0 }
 0x37f   : > { %v754_v62 = vpop.f32.mrf.mxu0 }
 0x380   : > { %v755_v14 = vadd.f32 %v754_v62, %v658_v4  ;;  %v772_v22 = vmax.f32 %v751_v16, 0.0 }
 0x381   : > { %v756_v63 = vpop.f32.mrf.mxu0 }
 0x382   : > { %v757_v11 = vadd.f32 %v756_v63, %v658_v4  ;;  %v773_v21 = vmax.f32 %v755_v14, 0.0 }
 0x383   : > { %v760_v0 = vpop.f32.mrf.mxu0 }
 0x384   : > { %v761_v10 = vadd.f32 %v760_v0, %v663_v3  ;;  %v774_v20 = vmax.f32 %v757_v11, 0.0 }
 0x385   : > { %v762_v2 = vpop.f32.mrf.mxu0 }
 0x386   : > { %v763_v8 = vadd.f32 %v762_v2, %v663_v3  ;;  %v775_v19 = vmax.f32 %v761_v10, 0.0 }
 0x387   : > { %v766_v5 = vpop.f32.mrf.mxu0 }
 0x388   : > { %v767_v6 = vadd.f32 %v766_v5, %v668_v1  ;;  %v776_v17 = vmax.f32 %v763_v8, 0.0 }
 0x389   : > { %v768_v7 = vpop.f32.mrf.mxu0 }
 0x38a   : > { %v769_v9 = vadd.f32 %v768_v7, %v668_v1  ;;  %v777_v15 = vmax.f32 %v767_v6, 0.0 }
 0x38c   : > { %v778_v12 = vmax.f32 %v769_v9, 0.0 }
 0x38e   : > { %813 = vmatprep.subr.mxu1 %v778_v12 }
 0x38f   : > { %814 = vmatpush1.msra.mxu1 %v777_v15 }
 0x390   : > { %815 = vmatprep.subr.mxu1 %v776_v17 }
 0x391   : > { %816 = vmatpush1.msra.mxu1 %v775_v19 }
 0x392   : > { %817 = vmatprep.subr.mxu1 %v774_v20 }
 0x393   : > { %818 = vmatpush1.msra.mxu1 %v773_v21 }
 0x394   : > { %819 = vmatprep.subr.mxu1 %v772_v22 }
 0x395   : > { %820 = vmatpush1.msra.mxu1 %v771_v23 }
 0x396   : > { %1012 = vmatmul.mubr.msk.f32.vlgmr.msra.gmra.mxu1 %vm404_vm1, %v779_v24 }
 0x456   : > { %v855_v26 = vpop.f32.mrf.mxu1 }
 0x457   : > { %v856_v27 = vadd.f32 %v855_v26, %v784_v25 }
 0x458   : > { %v857_v28 = vpop.f32.mrf.mxu1 }
 0x459   : > { %v860_v29 = vand.u32 2147483647, %v856_v27  ;;  %v858_v30 = vadd.f32 %v857_v28, %v784_v25  ;;  %vm874_vm3 = vcmp.ge.f32.partialorder %v856_v27, 0.0 }
 0x45b   : > { %v862_v31 = vsub.f32 0.0, %v860_v29  ;;  %v861_v32 = vand.u32 2147483647, %v858_v30  ;;  %vm875_vm4 = vcmp.ge.f32.partialorder %v858_v30, 0.0 }
 0x45d   : > { %v864_v33 = vmul.f32 1.442695, %v862_v31  ;;  %v863_v34 = vsub.f32 0.0, %v861_v32 }
 0x45f   : > { %1074 = vpow2.f32 %v864_v33  ;;  %v866_v35 = vmul.f32 1.442695, %v863_v34 }
 0x461   : > { %1076 = vpow2.f32 %v866_v35 }
 0x46c   : > { %v1075_v36 = vpop.eup %1074 }
 0x46d   : > { %v868_v37 = vadd.f32 1.0, %v1075_v36 }
 0x46e   : > { %v1077_v38 = vpop.eup %1076 }
 0x46f   : > { %1078 = vrcp.f32 %v868_v37  ;;  %v869_v39 = vadd.f32 1.0, %v1077_v38 }
 0x471   : > { %1080 = vrcp.f32 %v869_v39 }
 0x47c   : > { %v1079_v40 = vpop.eup %1078 }
 0x47d   : > { %v876_v41 = vmul.f32 %v1079_v40, %v1075_v36 }
 0x47e   : > { %v1081_v42 = vpop.eup %1080 }
 0x47f   : > { %v878_v43 = vsel %vm874_vm3, %v1079_v40, %v876_v41  ;;  %v877_v44 = vmul.f32 %v1081_v42, %v1077_v38 }
 0x480   : > { %880 = vst [vmem:[%s1335_s14] sm:$0xff] %v878_v43 }
 0x481   : > { %v879_v45 = vsel %vm875_vm4, %v1081_v42, %v877_v44 }
 0x482   : > { %881 = vst [vmem:[%s1335_s14 + $0x8] sm:$0xff] %v879_v45 }
 0x483   : > { %1095 = shalt.err (!%p1092_p7)
}
 0x484   : > { %s1096_s14 = scalar_lea.hbm %s1378_s22, 1792  ;;  %s1100_s6 = scalar_lea.hbm %s1428_s4, 5376 }
 0x485   : > { %p1097_p9 = scmp.ne.s32.totalorder %s1378_s22, %s1096_s14  ;;  %p1101_p12 = scmp.lt.s32.totalorder %s1378_s22, %s1428_s4 }
 0x486   : > { %p1102_p13 = scmp.lt.s32.totalorder %s1100_s6, %s1096_s14 }
 0x487   : > { %p1098_p10 = pnand %p1097_p9, %p1214_p6 }
 0x488   : > { %p1103_p0 = por %p1102_p13, %p1101_p12 }
 0x489   : > { %p1099_p11 = pneg %p1098_p10 }
 0x48b   : > { %p1104_p1 = pnand %p1103_p0, %p1099_p11 }
 0x48d   : > { %1107 = shalt.err (!%p1104_p1)
}
 0x48e   : > { %s1147_s9 = smov 256   ;;  %s1148_s10 = smov 768  }
 0x48f   : > { %s1149_s13 = smov 16  }
 0x490   : > { %1020 = dma.vmem_to_hbm [thread:$0]  (%p1214_p6), %s1380_s11, 1792, %s1378_s22, %s895_s19, %s1147_s9, %s1148_s10, %s1149_s13  }
 0x491 PF: > { %p1026_p2 = scmp.ge.s32.totalorder %s1142_s18, 2  ;;  %s923_s20 = sand.u32 1, %s1130_s15  }
 0x492   : > { %s924_s23 = scalar_lea.sflag [#allocation4], %s923_s20 }
 0x493   : > { %p1023_p3 = pnand %p1026_p2, %p1218_p8 }
 0x495   : > { %p1024_p4 = pneg %p1023_p3 }
 0x497   : > { %1125 = dma.done.wait (%p1024_p4), %s924_s23, 1792  }
 0x498   : > { %1127 = vsyncadd (%p1024_p4), %s924_s23, 4294965504  ;;  %p14_p5 = scmp.ge.s32.totalorder %s1200_s21, 5   ;;  %s1431_s15 = smov %s1134_s16 }
 0x499   : > { %s1432_s16 = smov %s1138_s17  ;;  %s1433_s17 = smov %s1212_s24 }
 0x49a   : > { %s1434_s18 = smov %s1200_s21  ;;  %16 = sbr.rel (!%p14_p5) target bundleno = 3 (0x3), region = 102 }
 0x49f   :  { %929 = vsyncpa [#allocation4], 1 }
 0x4a0   :  { %931 = vsyncpa [#allocation4 + $0x1], 1 }

</bundles_post_ra>
